<compile_context>
chip_gen: v6e
topology: v6e:2x2x1
jax: 0.10.0
libtpu: 0.0.40
codegen_flags: <defaults>
</compile_context>

<pallas_src>
import jax
import jax.numpy as jnp
from jax.experimental import pallas as pl
from jax.experimental.pallas import tpu as pltpu


def actor_critic_kernel(x_ref, w1_ref, b1_ref, w2_ref, b2_ref,
                        wh_ref, bh_ref, out_ref):
    x = x_ref[...]
    # fc1 + ReLU
    h = jnp.dot(x, w1_ref[...], preferred_element_type=jnp.float32) + b1_ref[...]
    h = jnp.maximum(h, 0.0)
    # fc2 + ReLU
    h = jnp.dot(h, w2_ref[...], preferred_element_type=jnp.float32) + b2_ref[...]
    h = jnp.maximum(h, 0.0)
    # merged (actor | critic | zero-pad) head -> single lane-dense store
    out_ref[...] = (
        jnp.dot(h, wh_ref[...], preferred_element_type=jnp.float32) + bh_ref[...]
    )


def actor_critic_forward(x, packed_params, n_actions):
    """Returns (logits (B, n_actions), value (B, 1))."""
    w1, b1, w2, b2, wh, bh = packed_params
    B, in_dim = x.shape
    hidden = w1.shape[1]
    out_pad = wh.shape[1]          # lane-padded head width (multiple of 128)

    # Row tile: keep whole batch if small (block == full dim is always legal);
    # otherwise use 512-row tiles (multiple of 8) sized well under VMEM even
    # with double-buffering on v7x's 64 MiB VMEM.
    TB = B if B <= 512 else 512
    grid = (pl.cdiv(B, TB),)

    resident = lambda a: pl.BlockSpec(a.shape, lambda i: (0, 0))

    flops = 2 * B * (in_dim * hidden + hidden * hidden + hidden * out_pad)
    bytes_accessed = 4 * (
        x.size + w1.size + b1.size + w2.size + b2.size + wh.size + bh.size
        + B * out_pad
    )

    out = pl.pallas_call(
        actor_critic_kernel,
        out_shape=jax.ShapeDtypeStruct((B, out_pad), jnp.float32),
        grid=grid,
        in_specs=[
            pl.BlockSpec((TB, in_dim), lambda i: (i, 0)),   # x: blocked over rows
            resident(w1), resident(b1),                     # weights stay in VMEM
            resident(w2), resident(b2),
            resident(wh), resident(bh),
        ],
        out_specs=pl.BlockSpec((TB, out_pad), lambda i: (i, 0)),
        compiler_params=pltpu.CompilerParams(
            dimension_semantics=("parallel",),
        ),
        cost_estimate=pl.CostEstimate(
            flops=flops, transcendentals=0, bytes_accessed=bytes_accessed
        ),
    )(x, w1, b1, w2, b2, wh, bh)

    logits = out[:, :n_actions]
    value = out[:, n_actions:n_actions + 1]
    return logits, value


def init_params(key, in_dim, n_actions, hidden=64):
    """PyTorch-style uniform init; returns the raw (per-layer) parameters."""
    ks = jax.random.split(key, 8)

    def lin(kw, kb, fan_in, fan_out):
        bound = 1.0 / jnp.sqrt(fan_in)
        w = jax.random.uniform(kw, (fan_in, fan_out), jnp.float32, -bound, bound)
        b = jax.random.uniform(kb, (1, fan_out), jnp.float32, -bound, bound)
        return w, b

    w1, b1 = lin(ks[0], ks[1], in_dim, hidden)
    w2, b2 = lin(ks[2], ks[3], hidden, hidden)
    wa, ba = lin(ks[4], ks[5], hidden, n_actions)
    wc, bc = lin(ks[6], ks[7], hidden, 1)
    return (w1, b1, w2, b2, wa, ba, wc, bc)


def pack_params(params, n_actions):
    """Pre-pack (once, outside the hot path): merge actor|critic heads and pad
    the merged head to a 128-lane multiple so the kernel output is lane-dense."""
    w1, b1, w2, b2, wa, ba, wc, bc = params
    hidden = w1.shape[1]
    head_cols = n_actions + 1
    out_pad = max(128, ((head_cols + 127) // 128) * 128)

    wh = jnp.zeros((hidden, out_pad), jnp.float32)
    wh = wh.at[:, :n_actions].set(wa)
    wh = wh.at[:, n_actions:head_cols].set(wc)

    bh = jnp.zeros((1, out_pad), jnp.float32)
    bh = bh.at[:, :n_actions].set(ba)
    bh = bh.at[:, n_actions:head_cols].set(bc)

    return (w1, b1, w2, b2, wh, bh)


if __name__ == "__main__":
    key = jax.random.PRNGKey(0)
    in_dim, n_actions, hidden, batch = 16, 4, 64, 8

    k_params, k_x = jax.random.split(key)
    params = init_params(k_params, in_dim, n_actions, hidden)
    packed = pack_params(params, n_actions)
    x = jax.random.normal(k_x, (batch, in_dim), dtype=jnp.float32)

    logits, value = actor_critic_forward(x, packed, n_actions)
    jax.block_until_ready((logits, value))

    # Reference check in plain JAX against the original (unmerged) parameters.
    w1, b1, w2, b2, wa, ba, wc, bc = params
    h = jnp.maximum(x @ w1 + b1, 0.0)
    h = jnp.maximum(h @ w2 + b2, 0.0)
    ref_logits = h @ wa + ba
    ref_value = h @ wc + bc

    assert logits.shape == (batch, n_actions) and value.shape == (batch, 1)
    assert jnp.allclose(logits, ref_logits, atol=1e-5)
    assert jnp.allclose(value, ref_value, atol=1e-5)

    print("KERNEL_OK")
</pallas_src>

<mosaic_0001>
module attributes {stable_mosaic.version = 11 : i64} {
  func.func @actor_critic_kernel(%arg0: i32, %arg1: memref<8x16xf32, #tpu.memory_space<vmem>>, %arg2: memref<16x64xf32, #tpu.memory_space<vmem>>, %arg3: memref<1x64xf32, #tpu.memory_space<vmem>>, %arg4: memref<64x64xf32, #tpu.memory_space<vmem>>, %arg5: memref<1x64xf32, #tpu.memory_space<vmem>>, %arg6: memref<64x128xf32, #tpu.memory_space<vmem>>, %arg7: memref<1x128xf32, #tpu.memory_space<vmem>>, %arg8: memref<8x128xf32, #tpu.memory_space<vmem>>) attributes {dimension_semantics = [#tpu.dimension_semantics<parallel>], iteration_bounds = array<i64: 1>, scalar_prefetch = 0 : i64, scratch_operands = 0 : i64, tpu.core_type = #tpu.core_type<tc>, window_params = [{transform_indices = @transform_0, window_bounds = array<i64: 8, 16>}, {pipeline_mode = #tpu.pipeline_mode<synchronous>, transform_indices = @transform_1, window_bounds = array<i64: 16, 64>}, {pipeline_mode = #tpu.pipeline_mode<synchronous>, transform_indices = @transform_2, window_bounds = array<i64: 1, 64>}, {pipeline_mode = #tpu.pipeline_mode<synchronous>, transform_indices = @transform_3, window_bounds = array<i64: 64, 64>}, {pipeline_mode = #tpu.pipeline_mode<synchronous>, transform_indices = @transform_4, window_bounds = array<i64: 1, 64>}, {pipeline_mode = #tpu.pipeline_mode<synchronous>, transform_indices = @transform_5, window_bounds = array<i64: 64, 128>}, {pipeline_mode = #tpu.pipeline_mode<synchronous>, transform_indices = @transform_6, window_bounds = array<i64: 1, 128>}, {transform_indices = @transform_7, window_bounds = array<i64: 8, 128>}]} {
    %c0 = arith.constant 0 : index
    %c0_0 = arith.constant 0 : index
    %0 = vector.load %arg1[%c0, %c0_0] : memref<8x16xf32, #tpu.memory_space<vmem>>, vector<8x16xf32>
    %c0_1 = arith.constant 0 : index
    %c0_2 = arith.constant 0 : index
    %1 = vector.load %arg2[%c0_1, %c0_2] : memref<16x64xf32, #tpu.memory_space<vmem>>, vector<16x64xf32>
    %cst = arith.constant dense<0.000000e+00> : vector<8x64xf32>
    %2 = tpu.matmul %0, %1, %cst {dimension_numbers = #tpu.dot_dimension_numbers<[1], [0], [0], [1], [0, 0, 1, 1], [], []>} : vector<8x16xf32>, vector<16x64xf32>, vector<8x64xf32> -> vector<8x64xf32>
    %c0_3 = arith.constant 0 : index
    %c0_4 = arith.constant 0 : index
    %3 = vector.load %arg3[%c0_3, %c0_4] : memref<1x64xf32, #tpu.memory_space<vmem>>, vector<1x64xf32>
    %4 = vector.broadcast %3 : vector<1x64xf32> to vector<8x64xf32>
    %5 = arith.addf %2, %4 : vector<8x64xf32>
    %cst_5 = arith.constant 0.000000e+00 : f32
    %6 = vector.broadcast %cst_5 : f32 to vector<8x64xf32>
    %7 = arith.maximumf %5, %6 : vector<8x64xf32>
    %c0_6 = arith.constant 0 : index
    %c0_7 = arith.constant 0 : index
    %8 = vector.load %arg4[%c0_6, %c0_7] : memref<64x64xf32, #tpu.memory_space<vmem>>, vector<64x64xf32>
    %cst_8 = arith.constant dense<0.000000e+00> : vector<8x64xf32>
    %9 = tpu.matmul %7, %8, %cst_8 {dimension_numbers = #tpu.dot_dimension_numbers<[1], [0], [0], [1], [0, 0, 1, 1], [], []>} : vector<8x64xf32>, vector<64x64xf32>, vector<8x64xf32> -> vector<8x64xf32>
    %c0_9 = arith.constant 0 : index
    %c0_10 = arith.constant 0 : index
    %10 = vector.load %arg5[%c0_9, %c0_10] : memref<1x64xf32, #tpu.memory_space<vmem>>, vector<1x64xf32>
    %11 = vector.broadcast %10 : vector<1x64xf32> to vector<8x64xf32>
    %12 = arith.addf %9, %11 : vector<8x64xf32>
    %cst_11 = arith.constant 0.000000e+00 : f32
    %13 = vector.broadcast %cst_11 : f32 to vector<8x64xf32>
    %14 = arith.maximumf %12, %13 : vector<8x64xf32>
    %c0_12 = arith.constant 0 : index
    %c0_13 = arith.constant 0 : index
    %15 = vector.load %arg6[%c0_12, %c0_13] : memref<64x128xf32, #tpu.memory_space<vmem>>, vector<64x128xf32>
    %cst_14 = arith.constant dense<0.000000e+00> : vector<8x128xf32>
    %16 = tpu.matmul %14, %15, %cst_14 {dimension_numbers = #tpu.dot_dimension_numbers<[1], [0], [0], [1], [0, 0, 1, 1], [], []>} : vector<8x64xf32>, vector<64x128xf32>, vector<8x128xf32> -> vector<8x128xf32>
    %c0_15 = arith.constant 0 : index
    %c0_16 = arith.constant 0 : index
    %17 = vector.load %arg7[%c0_15, %c0_16] : memref<1x128xf32, #tpu.memory_space<vmem>>, vector<1x128xf32>
    %18 = vector.broadcast %17 : vector<1x128xf32> to vector<8x128xf32>
    %19 = arith.addf %16, %18 : vector<8x128xf32>
    %c0_17 = arith.constant 0 : index
    %c0_18 = arith.constant 0 : index
    %20 = vector.load %arg8[%c0_17, %c0_18] : memref<8x128xf32, #tpu.memory_space<vmem>>, vector<8x128xf32>
    tpu.vector_store %arg8[%c0_17, %c0_18], %19 {strides = array<i32>} : memref<8x128xf32, #tpu.memory_space<vmem>>, vector<8x128xf32>,
    return
  }
  func.func @transform_0(%arg0: i32) -> (i32, i32) {
    %c0_i32 = arith.constant 0 : i32
    %c0_i32_0 = arith.constant 0 : i32
    return %arg0, %c0_i32 : i32, i32
  }
  func.func @transform_1(%arg0: i32) -> (i32, i32) {
    %c0_i32 = arith.constant 0 : i32
    %c0_i32_0 = arith.constant 0 : i32
    %c0_i32_1 = arith.constant 0 : i32
    return %c0_i32, %c0_i32_0 : i32, i32
  }
  func.func @transform_2(%arg0: i32) -> (i32, i32) {
    %c0_i32 = arith.constant 0 : i32
    %c0_i32_0 = arith.constant 0 : i32
    %c0_i32_1 = arith.constant 0 : i32
    return %c0_i32, %c0_i32_0 : i32, i32
  }
  func.func @transform_3(%arg0: i32) -> (i32, i32) {
    %c0_i32 = arith.constant 0 : i32
    %c0_i32_0 = arith.constant 0 : i32
    %c0_i32_1 = arith.constant 0 : i32
    return %c0_i32, %c0_i32_0 : i32, i32
  }
  func.func @transform_4(%arg0: i32) -> (i32, i32) {
    %c0_i32 = arith.constant 0 : i32
    %c0_i32_0 = arith.constant 0 : i32
    %c0_i32_1 = arith.constant 0 : i32
    return %c0_i32, %c0_i32_0 : i32, i32
  }
  func.func @transform_5(%arg0: i32) -> (i32, i32) {
    %c0_i32 = arith.constant 0 : i32
    %c0_i32_0 = arith.constant 0 : i32
    %c0_i32_1 = arith.constant 0 : i32
    return %c0_i32, %c0_i32_0 : i32, i32
  }
  func.func @transform_6(%arg0: i32) -> (i32, i32) {
    %c0_i32 = arith.constant 0 : i32
    %c0_i32_0 = arith.constant 0 : i32
    %c0_i32_1 = arith.constant 0 : i32
    return %c0_i32, %c0_i32_0 : i32, i32
  }
  func.func @transform_7(%arg0: i32) -> (i32, i32) {
    %c0_i32 = arith.constant 0 : i32
    %c0_i32_0 = arith.constant 0 : i32
    return %arg0, %c0_i32 : i32, i32
  }
}

</mosaic_0001>

<bundles_post_ra>
// kernel: tpu_custom_call.1
= control target key start
LH: loop header
LB: loop body
LE: loop exit
PB: predicated region body
PF: predicated region fallthrough
CT: control target
= control target key end

     0   :  { %12 = vsyncpa [#allocation3], 0  ;;  %s658_s0 = inlined_call_operand.hbm [shape: f32[8,16], index: 0, kind: input, shape index: {}]   ;;  %s659_s1 = inlined_call_operand.hbm [shape: f32[16,64], index: 1, kind: input, shape index: {}]   ;;  %s660_s2 = inlined_call_operand.vmem [shape: f32[1,64], index: 2, kind: input, shape index: {}]   ;;  %s661_s3 = inlined_call_operand.hbm [shape: f32[64,64], index: 3, kind: input, shape index: {}]   ;;  %s662_s4 = inlined_call_operand.vmem [shape: f32[1,64], index: 4, kind: input, shape index: {}]   ;;  %s663_s5 = inlined_call_operand.hbm [shape: f32[64,128], index: 5, kind: input, shape index: {}]   ;;  %s664_s6 = inlined_call_operand.vmem [shape: f32[1,128], index: 6, kind: input, shape index: {}]   ;;  %s665_s7 = inlined_call_operand.hbm [shape: f32[8,128], index: 7, kind: output, shape index: {}]  }
   0x1   :  { %13 = vsyncpa [#allocation6], 0 }
   0x2   :  { %14 = vsyncpa [#allocation9], 0 }
   0x3   :  { %15 = vsyncpa [#allocation4], 0  ;;  %s550_s24 = smov [#allocation5]  }
   0x4   :  { %s31_s25 = sshll.u32 %s550_s24, 4  ;;  %s32_s25 = int_to_ptr.vmem [resolvable:$true] %s31_s25 }
   0x5   :  { %s450_s26 = scalar_lea.vmem %s32_s25, 256  ;;  %p455_p1 = scmp.lt.s32.totalorder %s32_s25, %s32_s25 }
   0x6   :  { %p451_p0 = scmp.ne.s32.totalorder %s32_s25, %s450_s26  ;;  %p456_p2 = scmp.lt.s32.totalorder %s450_s26, %s450_s26 }
   0x8   :  { %p457_p3 = por %p456_p2, %p455_p1 }
   0xa   :  { %p458_p4 = pnand %p457_p3, %p451_p0 }
   0xc   :  { %461 = shalt.err (!%p458_p4)
}
   0xd   :  { %s551_s27 = smov 128   ;;  %s552_s28 = smov 8  }
   0xe   :  { %37 = dma.hbm_to_vmem [thread:$0]  %s659_s1, 256, %s32_s25, [#allocation6], %s551_s27, %s551_s27, %s552_s28  }
   0xf   :  { %s553_s8 = smov [#allocation2]   ;;  %s554_s10 = smov [#allocation7]  }
  0x10   :  { %s22_s9 = sshll.u32 %s553_s8, 4  ;;  %s45_s11 = sshll.u32 %s554_s10, 4  ;;  %s23_s9 = int_to_ptr.vmem [resolvable:$true] %s22_s9  ;;  %s46_s11 = int_to_ptr.vmem [resolvable:$true] %s45_s11 }
  0x11   :  { %s470_s12 = scalar_lea.vmem %s23_s9, 128  ;;  %p475_p6 = scmp.lt.s32.totalorder %s23_s9, %s23_s9 }
  0x12   :  { %p471_p5 = scmp.ne.s32.totalorder %s23_s9, %s470_s12  ;;  %p476_p7 = scmp.lt.s32.totalorder %s470_s12, %s470_s12 }
  0x14   :  { %p477_p8 = por %p476_p7, %p475_p6 }
  0x16   :  { %p478_p9 = pnand %p477_p8, %p471_p5 }
  0x18   :  { %481 = shalt.err (!%p478_p9)
}
  0x19   :  { %25 = dma.hbm_to_vmem [thread:$0]  %s658_s0, 128, %s23_s9, [#allocation3]  }
  0x1a   :  { %s490_s15 = scalar_lea.vmem %s46_s11, 1024  ;;  %p495_p11 = scmp.lt.s32.totalorder %s46_s11, %s46_s11 }
  0x1b   :  { %p491_p10 = scmp.ne.s32.totalorder %s46_s11, %s490_s15  ;;  %p496_p12 = scmp.lt.s32.totalorder %s490_s15, %s490_s15 }
  0x1d   :  { %p497_p13 = por %p496_p12, %p495_p11 }
  0x1f   :  { %p498_p0 = pnand %p497_p13, %p491_p10 }
  0x21   :  { %501 = shalt.err (!%p498_p0)
}
  0x22   :  { %51 = dma.hbm_to_vmem [thread:$0]  %s661_s3, 1024, %s46_s11, [#allocation6], %s551_s27, %s551_s27, %s552_s28  }
  0x23   :  { %s555_s17 = smov [#allocation8]  }
  0x24   :  { %s59_s18 = sshll.u32 %s555_s17, 4  ;;  %s60_s18 = int_to_ptr.vmem [resolvable:$true] %s59_s18 }
  0x25   :  { %s510_s19 = scalar_lea.vmem %s60_s18, 1024  ;;  %p515_p2 = scmp.lt.s32.totalorder %s60_s18, %s60_s18 }
  0x26   :  { %p511_p1 = scmp.ne.s32.totalorder %s60_s18, %s510_s19  ;;  %p516_p3 = scmp.lt.s32.totalorder %s510_s19, %s510_s19 }
  0x28   :  { %p517_p4 = por %p516_p3, %p515_p2 }
  0x2a   :  { %p518_p5 = pnand %p517_p4, %p511_p1 }
  0x2c   :  { %521 = shalt.err (!%p518_p5)
}
  0x2d   :  { %65 = dma.hbm_to_vmem [thread:$0]  %s663_s5, 1024, %s60_s18, [#allocation9], %s551_s27, %s551_s27, %s552_s28  }
  0x2e   :  { %542 = dma.done.wait [#allocation3], 128  }
  0x2f   :  { %543 = vsyncadd [#allocation3], 4294967168 }
  0x30   :  { %544 = dma.done.wait [#allocation6], 1280  }
  0x31   :  { %545 = vsyncadd [#allocation6], 4294966016 }
  0x32   :  { %546 = dma.done.wait [#allocation9], 1024  }
  0x33   :  { %547 = vsyncadd [#allocation9], 4294966272  ;;  %v556_v0 = vmov 0.0   ;;  %vm557_vm0 = vmmov 0   ;;  %v82_v1 = vld [vmem:[#allocation5 + $0x8] sm:$0xff]  ;;  %v81_v2 = vld [vmem:[#allocation5] sm:$0xff] }
  0x34   :  { %388 = vmatprep.subr.mxu0 %v556_v0  ;;  %392 = vmatprep.mubr.msk.f32.mxu0 %vm557_vm0, %v556_v0  ;;  %v80_v3 = vld [vmem:[#allocation2] sm:$0xff]  ;;  %vm90_vm1 = vcmask 130048   ;;  %v172_v4 = vld [vmem:[#allocation7 + $0x38] sm:$0xff]  ;;  %v171_v5 = vld [vmem:[#allocation7 + $0x30] sm:$0xff]  ;;  %vm180_vm2 = vcmask 523264   ;;  %s558_s24 = smov [#allocation10]  }
  0x35   :  { %395 = vmatprep.subr.mxu1 %v556_v0  ;;  %411 = vmatprep.mubr.msk.f32.mxu1 %vm557_vm0, %v556_v0  ;;  %v170_v6 = vld [vmem:[#allocation7 + $0x28] sm:$0xff]  ;;  %v169_v7 = vld [vmem:[#allocation7 + $0x20] sm:$0xff]  ;;  %v168_v8 = vld [vmem:[#allocation7 + $0x18] sm:$0xff]  ;;  %s350_s25 = sshll.u32 %s558_s24, 4  ;;  %s351_s25 = int_to_ptr.vmem [resolvable:$true] %s350_s25 }
  0x36   :  { %389 = vmatpush3.msra.mxu0 %v82_v1  ;;  %396 = vmatpush3.msra.mxu1 %v172_v4  ;;  %v167_v9 = vld [vmem:[#allocation7 + $0x10] sm:$0xff]  ;;  %v166_v10 = vld [vmem:[#allocation7 + $0x8] sm:$0xff]  ;;  %v165_v11 = vld [vmem:[#allocation7] sm:$0xff]  ;;  %s522_s26 = scalar_lea.vmem %s351_s25, 128  ;;  %p527_p7 = scmp.lt.s32.totalorder %s351_s25, %s351_s25 }
  0x37   :  { %390 = vmatprep.subr.mxu0 %v556_v0  ;;  %397 = vmatprep.subr.mxu1 %v556_v0  ;;  %v262_v12 = vld [vmem:[#allocation8 + $0x38] sm:$0xff]  ;;  %v261_v13 = vld [vmem:[#allocation8 + $0x30] sm:$0xff]  ;;  %v260_v14 = vld [vmem:[#allocation8 + $0x28] sm:$0xff]  ;;  %p523_p6 = scmp.ne.s32.totalorder %s351_s25, %s522_s26  ;;  %p528_p8 = scmp.lt.s32.totalorder %s522_s26, %s522_s26 }
  0x38   :  { %391 = vmatpush3.msra.mxu0 %v81_v2  ;;  %398 = vmatpush3.msra.mxu1 %v171_v5  ;;  %v259_v15 = vld [vmem:[#allocation8 + $0x20] sm:$0xff]  ;;  %v258_v16 = vld [vmem:[#allocation8 + $0x18] sm:$0xff]  ;;  %v361_v17 = vld [vmem:[%s660_s2] ss:$0 sm:$0xff] }
  0x39   :  { %393 = vmatmul.mubr.msk.f32.vlgmr.msra.gmra.mxu0 %vm90_vm1, %v80_v3  ;;  %399 = vmatprep.subr.mxu1 %v556_v0  ;;  %v257_v22 = vld [vmem:[#allocation8 + $0x10] sm:$0xff]  ;;  %v256_v23 = vld [vmem:[#allocation8 + $0x8] sm:$0xff]  ;;  %v255_v24 = vld [vmem:[#allocation8] sm:$0xff]  ;;  %p529_p9 = por %p528_p8, %p527_p7 }
  0x3a   :  { %414 = vmatprep.subr.mxu0 %v556_v0  ;;  %400 = vmatpush3.msra.mxu1 %v170_v6  ;;  %v363_v25 = vld [vmem:[%s662_s4] ss:$0 sm:$0xff] }
  0x3b   :  { %430 = vmatprep.mubr.msk.f32.mxu0 %vm557_vm0, %v556_v0  ;;  %401 = vmatprep.subr.mxu1 %v556_v0  ;;  %v365_v30 = vld [vmem:[%s664_s6] ss:$0 sm:$0xff]  ;;  %p530_p10 = pnand %p529_p9, %p523_p6 }
  0x3c   :  { %402 = vmatpush3.msra.mxu1 %v169_v7  ;;  %415 = vmatpush3.msra.mxu0 %v262_v12 }
  0x3d   :  { %403 = vmatprep.subr.mxu1 %v556_v0  ;;  %416 = vmatprep.subr.mxu0 %v556_v0 }
  0x3e   :  { %404 = vmatpush3.msra.mxu1 %v168_v8  ;;  %417 = vmatpush3.msra.mxu0 %v261_v13 }
  0x3f   :  { %405 = vmatprep.subr.mxu1 %v556_v0  ;;  %418 = vmatprep.subr.mxu0 %v556_v0 }
  0x40   :  { %406 = vmatpush3.msra.mxu1 %v167_v9  ;;  %419 = vmatpush3.msra.mxu0 %v260_v14 }
  0x41   :  { %407 = vmatprep.subr.mxu1 %v556_v0  ;;  %420 = vmatprep.subr.mxu0 %v556_v0 }
  0x42   :  { %408 = vmatpush3.msra.mxu1 %v166_v10  ;;  %421 = vmatpush3.msra.mxu0 %v259_v15 }
  0x43   :  { %409 = vmatprep.subr.mxu1 %v556_v0  ;;  %422 = vmatprep.subr.mxu0 %v556_v0 }
  0x44   :  { %410 = vmatpush3.msra.mxu1 %v165_v11  ;;  %423 = vmatpush3.msra.mxu0 %v258_v16 }
  0x45   :  { %424 = vmatprep.subr.mxu0 %v556_v0 }
  0x46   :  { %425 = vmatpush3.msra.mxu0 %v257_v22 }
  0x47   :  { %426 = vmatprep.subr.mxu0 %v556_v0 }
  0x48   :  { %427 = vmatpush3.msra.mxu0 %v256_v23 }
  0x49   :  { %428 = vmatprep.subr.mxu0 %v556_v0 }
  0x4a   :  { %429 = vmatpush3.msra.mxu0 %v255_v24 }
  0xf9   :  { %v160_v18 = vpop.f32.mrf.mxu0 }
  0xfa   :  { %v161_v19 = vadd.f32 %v361_v17, %v160_v18 }
  0xfb   :  { %v394_v20 = vpop.f32.mrf.mxu0 }
  0xfc   :  { %v164_v21 = vmax.f32 %v161_v19, 0.0 }
  0xfe   :  { %412 = vmatmul.mubr.msk.f32.vlgmr.msra.gmra.mxu1 %vm180_vm2, %v164_v21 }
 0x1be   :  { %v250_v26 = vpop.f32.mrf.mxu1 }
 0x1bf   :  { %v251_v27 = vadd.f32 %v363_v25, %v250_v26 }
 0x1c0   :  { %v413_v28 = vpop.f32.mrf.mxu1 }
 0x1c1   :  { %v254_v29 = vmax.f32 %v251_v27, 0.0 }
 0x1c3   :  { %431 = vmatmul.mubr.msk.f32.vlgmr.msra.gmra.mxu0 %vm180_vm2, %v254_v29 }
 0x283   :  { %v339_v31 = vpop.f32.mrf.mxu0 }
 0x284   :  { %v340_v32 = vadd.f32 %v365_v30, %v339_v31 }
 0x285   :  { %v432_v33 = vpop.f32.mrf.mxu0 }
 0x286   :  { %343 = vst [vmem:[#allocation10] sm:$0xff] %v340_v32 }
 0x287   :  { %533 = shalt.err (!%p530_p10)
}
 0x288   :  { %353 = dma.vmem_to_hbm [thread:$0]  %s351_s25, 128, %s665_s7, [#allocation4]  }
 0x289   :  { %548 = dma.done.wait [#allocation4], 128  }
 0x28a   :  { %549 = vsyncadd [#allocation4], 4294967168 }
 0x28b   :  { %357 = vsyncpa [#allocation3], 1 }
 0x28c   :  { %358 = vsyncpa [#allocation6], 1 }
 0x28d   :  { %359 = vsyncpa [#allocation9], 1 }
 0x28e   :  { %360 = vsyncpa [#allocation4], 1 }

</bundles_post_ra>
